<compile_context>
chip_gen: v7x
topology: tpu7x:2x2x1
jax: 0.10.0
libtpu: 0.0.40
codegen_flags: <defaults>
</compile_context>

<pallas_src>
import jax
import jax.numpy as jnp
from jax.experimental import pallas as pl
from jax.experimental.pallas import tpu as pltpu


def auroc_kernel(pos_ref, neg_ref, w_ref, out_ref):
    # pos_ref / neg_ref : (tile_m, d)  -- instances on sublanes, features on lanes.
    # w_ref             : (1, d)       -- broadcast over rows on the VPU.
    # out_ref           : (tile_m, 1)
    diff = pos_ref[...] - neg_ref[...]                          # VPU elementwise
    score = jnp.sum(diff * w_ref[...], axis=-1, keepdims=True)  # VPU mul + XLU lane reduce
    out_ref[...] = (1.0 - score) ** 2                           # VPU elementwise


def _vmem_budget_bytes():
    """(input-tile budget, scoped vmem limit) per TPU generation."""
    try:
        kind = jax.devices()[0].device_kind.lower()
    except Exception:
        kind = ""
    if "v5" in kind or "v6" in kind:
        # 128 MiB physical VMEM: bigger tiles -> bigger DMA bursts, <3% step overhead.
        return 64 * 1024 * 1024, 96 * 1024 * 1024
    # v7x (64 MiB physical) or unknown: stay conservative.
    return 24 * 1024 * 1024, 32 * 1024 * 1024


def auroc_forward(data_pos, data_neg, w):
    """data_pos, data_neg: (N_m, d) float32; w: (d, 1) float32 -> (1, N_m)."""
    pos = jnp.asarray(data_pos, dtype=jnp.float32)              # no copy if already f32
    neg = jnp.asarray(data_neg, dtype=jnp.float32)
    n_m, d = pos.shape
    w_row = jnp.asarray(w, dtype=jnp.float32).reshape(1, d)     # tiny (d elements)

    input_budget, vmem_limit = _vmem_budget_bytes()

    # d-aware tile sizing: each (tile_m, d) f32 block occupies tile_m * lane-padded(d)
    # * 4 bytes of VMEM; 2 inputs x 2 pipeline buffers must fit the budget.
    d_lane = ((d + 127) // 128) * 128
    bytes_per_row = 4 * d_lane
    tile_m = input_budget // (4 * bytes_per_row)
    tile_m = max(8, (tile_m // 8) * 8)                          # sublane multiple of 8
    tile_m = min(tile_m, max(8, ((n_m + 7) // 8) * 8))          # don't exceed the array

    num_tiles = pl.cdiv(n_m, tile_m)                            # partial last block is OK:
                                                                # OOB rows never written back.
    out = pl.pallas_call(
        auroc_kernel,
        out_shape=jax.ShapeDtypeStruct((n_m, 1), jnp.float32),
        grid_spec=pltpu.PrefetchScalarGridSpec(
            num_scalar_prefetch=0,
            grid=(num_tiles,),
            in_specs=[
                pl.BlockSpec((tile_m, d), lambda i: (i, 0)),    # pos rows
                pl.BlockSpec((tile_m, d), lambda i: (i, 0)),    # neg rows
                pl.BlockSpec((1, d), lambda i: (0, 0)),         # w, resident across grid
            ],
            out_specs=pl.BlockSpec((tile_m, 1), lambda i: (i, 0)),
        ),
        compiler_params=pltpu.CompilerParams(
            dimension_semantics=("parallel",),                  # independent tiles -> megacore
            vmem_limit_bytes=vmem_limit,
        ),
        cost_estimate=pl.CostEstimate(
            flops=3 * n_m * d,                                  # sub, mul, add-reduce
            transcendentals=0,
            bytes_accessed=(2 * n_m * d + d + n_m) * 4,         # clearly mem-bound
        ),
    )(pos, neg, w_row)

    return out.reshape(1, n_m)                                  # free view: (N_m,1)->(1,N_m)


def _reference(data_pos, data_neg, w):
    pos = jnp.asarray(data_pos, dtype=jnp.float32)
    neg = jnp.asarray(data_neg, dtype=jnp.float32)
    w = jnp.asarray(w, dtype=jnp.float32)
    return (1.0 - jnp.matmul(w.T, (pos - neg).T)) ** 2


if __name__ == "__main__":
    key = jax.random.PRNGKey(0)
    k_w, k_pos, k_neg, k_pos2, k_neg2 = jax.random.split(key, 5)

    d = 32     # feature number
    n_m = 8    # instance (pair) number

    # Deterministic parameter init, shape (d, 1) as in the PyTorch module.
    w = jax.random.normal(k_w, (d, 1), dtype=jnp.float32)

    # Synthetic "lists" of positive / negative instances, (N_m, d).
    data_pos = jax.random.normal(k_pos, (n_m, d), dtype=jnp.float32)
    data_neg = jax.random.normal(k_neg, (n_m, d), dtype=jnp.float32)

    out = jax.block_until_ready(auroc_forward(data_pos, data_neg, w))
    ref = _reference(data_pos, data_neg, w)
    assert out.shape == (1, n_m)
    assert jnp.allclose(out, ref, atol=1e-5, rtol=1e-5)

    # Second check: instance count not a multiple of the tile exercises the
    # partial last block (masked output writeback), with no wrapper padding.
    n_m2 = 300
    data_pos2 = jax.random.normal(k_pos2, (n_m2, d), dtype=jnp.float32)
    data_neg2 = jax.random.normal(k_neg2, (n_m2, d), dtype=jnp.float32)
    out2 = jax.block_until_ready(auroc_forward(data_pos2, data_neg2, w))
    ref2 = _reference(data_pos2, data_neg2, w)
    assert out2.shape == (1, n_m2)
    assert jnp.allclose(out2, ref2, atol=1e-5, rtol=1e-5)

    print("KERNEL_OK")
</pallas_src>

<mosaic_0001>
module attributes {stable_mosaic.version = 11 : i64} {
  func.func @auroc_kernel(%arg0: i32, %arg1: memref<8x32xf32, #tpu.memory_space<vmem>>, %arg2: memref<8x32xf32, #tpu.memory_space<vmem>>, %arg3: memref<1x32xf32, #tpu.memory_space<vmem>>, %arg4: memref<8x1xf32, #tpu.memory_space<vmem>>) attributes {dimension_semantics = [#tpu.dimension_semantics<parallel>], iteration_bounds = array<i64: 1>, scalar_prefetch = 0 : i64, scratch_operands = 0 : i64, tpu.core_type = #tpu.core_type<tc>, window_params = [{transform_indices = @transform_0, window_bounds = array<i64: 8, 32>}, {transform_indices = @transform_1, window_bounds = array<i64: 8, 32>}, {pipeline_mode = #tpu.pipeline_mode<synchronous>, transform_indices = @transform_2, window_bounds = array<i64: 1, 32>}, {transform_indices = @transform_3, window_bounds = array<i64: 8, 1>}]} {
    %c0 = arith.constant 0 : index
    %c0_0 = arith.constant 0 : index
    %0 = vector.load %arg1[%c0, %c0_0] : memref<8x32xf32, #tpu.memory_space<vmem>>, vector<8x32xf32>
    %c0_1 = arith.constant 0 : index
    %c0_2 = arith.constant 0 : index
    %1 = vector.load %arg2[%c0_1, %c0_2] : memref<8x32xf32, #tpu.memory_space<vmem>>, vector<8x32xf32>
    %2 = arith.subf %0, %1 : vector<8x32xf32>
    %c0_3 = arith.constant 0 : index
    %c0_4 = arith.constant 0 : index
    %3 = vector.load %arg3[%c0_3, %c0_4] : memref<1x32xf32, #tpu.memory_space<vmem>>, vector<1x32xf32>
    %4 = vector.broadcast %3 : vector<1x32xf32> to vector<8x32xf32>
    %5 = arith.mulf %2, %4 : vector<8x32xf32>
    %cst = arith.constant dense<0.000000e+00> : vector<8xf32>
    %6 = vector.multi_reduction <add>, %5, %cst [1] : vector<8x32xf32> to vector<8xf32>
    %7 = vector.shape_cast %6 : vector<8xf32> to vector<8x1xf32>
    %cst_5 = arith.constant 1.000000e+00 : f32
    %8 = vector.broadcast %cst_5 : f32 to vector<8x1xf32>
    %9 = arith.subf %8, %7 : vector<8x1xf32>
    %10 = arith.mulf %9, %9 : vector<8x1xf32>
    %c0_6 = arith.constant 0 : index
    %c0_7 = arith.constant 0 : index
    %11 = vector.load %arg4[%c0_6, %c0_7] : memref<8x1xf32, #tpu.memory_space<vmem>>, vector<8x1xf32>
    tpu.vector_store %arg4[%c0_6, %c0_7], %10 {strides = array<i32>} : memref<8x1xf32, #tpu.memory_space<vmem>>, vector<8x1xf32>,
    return
  }
  func.func @transform_0(%arg0: i32) -> (i32, i32) {
    %c0_i32 = arith.constant 0 : i32
    %c0_i32_0 = arith.constant 0 : i32
    return %arg0, %c0_i32 : i32, i32
  }
  func.func @transform_1(%arg0: i32) -> (i32, i32) {
    %c0_i32 = arith.constant 0 : i32
    %c0_i32_0 = arith.constant 0 : i32
    return %arg0, %c0_i32 : i32, i32
  }
  func.func @transform_2(%arg0: i32) -> (i32, i32) {
    %c0_i32 = arith.constant 0 : i32
    %c0_i32_0 = arith.constant 0 : i32
    %c0_i32_1 = arith.constant 0 : i32
    return %c0_i32, %c0_i32_0 : i32, i32
  }
  func.func @transform_3(%arg0: i32) -> (i32, i32) {
    %c0_i32 = arith.constant 0 : i32
    %c0_i32_0 = arith.constant 0 : i32
    return %arg0, %c0_i32 : i32, i32
  }
}

</mosaic_0001>

<bundles_post_ra>
// kernel: tpu_custom_call.1
= control target key start
LH: loop header
LB: loop body
LE: loop exit
PB: predicated region body
PF: predicated region fallthrough
CT: control target
= control target key end

     0   :  { %8 = vsyncpa [#allocation3], 0  ;;  %s166_s0 = inlined_call_operand.hbm [shape: f32[8,32], index: 0, kind: input, shape index: {}]   ;;  %s167_s1 = inlined_call_operand.hbm [shape: f32[8,32], index: 1, kind: input, shape index: {}]   ;;  %s168_s2 = inlined_call_operand.vmem [shape: f32[1,32], index: 2, kind: input, shape index: {}]   ;;  %s169_s3 = inlined_call_operand.vmem [shape: f32[8,1], index: 3, kind: output, shape index: {}]  }
   0x1   :  { %9 = vsyncpa [#allocation5], 0  ;;  %s114_s12 = smov [#allocation2]   ;;  %s115_s14 = smov [#allocation4]  }
   0x2   :  { %s16_s13 = sshll.u32 %s114_s12, 4  ;;  %s26_s15 = sshll.u32 %s115_s14, 4  ;;  %s17_s13 = int_to_ptr.vmem [resolvable:$true] %s16_s13  ;;  %s27_s15 = int_to_ptr.vmem [resolvable:$true] %s26_s15 }
   0x3   :  { %s66_s18 = scalar_lea.hbm %s166_s0, 128 }
   0x4   :  { %p67_p0 = scmp.ne.s32.totalorder %s166_s0, %s66_s18  ;;  %p70_p1 = scmp.lt.u32.totalorder %s66_s18, %s166_s0 }
   0x6   :  { %p72_p2 = pnand %p70_p1, %p67_p0 }
   0x8   :  { %75 = shalt.err (!%p72_p2)
}
   0x9   :  { %s76_s23 = scalar_lea.vmem %s17_s13, 128  ;;  %p81_p4 = scmp.lt.s32.totalorder %s17_s13, %s17_s13 }
   0xa   :  { %p77_p3 = scmp.ne.s32.totalorder %s17_s13, %s76_s23  ;;  %p82_p5 = scmp.lt.s32.totalorder %s76_s23, %s76_s23 }
   0xc   :  { %p83_p6 = por %p82_p5, %p81_p4 }
   0xe   :  { %p84_p7 = pnand %p83_p6, %p77_p3 }
  0x10   :  { %87 = shalt.err (!%p84_p7)
}
  0x11   :  { %19 = dma.hbm_to_vmem [thread:$0]  %s166_s0, 128, %s17_s13, [#allocation3]  }
  0x12   :  { %s88_s28 = scalar_lea.hbm %s167_s1, 128 }
  0x13   :  { %p89_p8 = scmp.ne.s32.totalorder %s167_s1, %s88_s28  ;;  %p92_p9 = scmp.lt.u32.totalorder %s88_s28, %s167_s1 }
  0x15   :  { %p94_p10 = pnand %p92_p9, %p89_p8 }
  0x17   :  { %97 = shalt.err (!%p94_p10)
}
  0x18   :  { %s98_s6 = scalar_lea.vmem %s27_s15, 128  ;;  %p103_p12 = scmp.lt.s32.totalorder %s27_s15, %s27_s15 }
  0x19   :  { %p99_p11 = scmp.ne.s32.totalorder %s27_s15, %s98_s6  ;;  %p104_p13 = scmp.lt.s32.totalorder %s98_s6, %s98_s6 }
  0x1b   :  { %p105_p0 = por %p104_p13, %p103_p12 }
  0x1d   :  { %p106_p1 = pnand %p105_p0, %p99_p11 }
  0x1f   :  { %109 = shalt.err (!%p106_p1)
}
  0x20   :  { %29 = dma.hbm_to_vmem [thread:$0]  %s167_s1, 128, %s27_s15, [#allocation5]  }
  0x21   :  { %110 = dma.done.wait [#allocation3], 128  }
  0x22   :  { %111 = vsyncadd [#allocation3], 4294967168 }
  0x23   :  { %112 = dma.done.wait [#allocation5], 128  }
  0x24   :  { %113 = vsyncadd [#allocation5], 4294967168  ;;  %v38_v0 = vld [vmem:[#allocation2] sm:$0xff]  ;;  %v39_v1 = vld [vmem:[#allocation4] sm:$0xff]  ;;  %vm49_vm0 = vcmask 261120   ;;  %vm55_vm1 = vcmask 7168  }
  0x25   :  { %v63_v2 = vld [vmem:[%s168_s2] ss:$0 sm:$0xff]  ;;  %v40_v3 = vsub.f32 %v38_v0, %v39_v1 }
  0x27   :  { %v48_v4 = vmul.f32 %v63_v2, %v40_v3 }
  0x29   :  { %v50_v5 = vsel %vm49_vm0, %v48_v4, 0.0 }
  0x2a   :  { %51 = vadd.xlane.f32.xlu0 %v50_v5 }
  0xb7   :  { %v52_v6 = vpop.xlane.xlu0 %51 }
  0xb8   :  { %v53_v7 = vsub.f32 1.0, %v52_v6 }
  0xba   :  { %v54_v8 = vmul.f32 %v53_v7, %v53_v7 }
  0xbc   :  { %56 = vst.msk [vmem:[%s169_s3] sm:$0xff] %vm55_vm1, %v54_v8 }
  0xbd   :  { %61 = vsyncpa [#allocation3], 1 }
  0xbe   :  { %62 = vsyncpa [#allocation5], 1 }

</bundles_post_ra>
